<compile_context>
chip_gen: v5e
topology: v5e:2x2
jax: 0.10.0
libtpu: 0.0.40
codegen_flags: <defaults>
</compile_context>

<pallas_src>
import functools

import jax
import jax.numpy as jnp
from jax.experimental import pallas as pl
from jax.experimental.pallas import tpu as pltpu

LANE = 128   # lane width: pad all feature dims to a multiple of this
SUBLANE = 8  # f32 sublane granularity for the batch tile


def _round_up(n, m):
    return ((n + m - 1) // m) * m


def mlp_kernel(x_ref, *refs):
    """Fused MLP forward on one (TB, D) batch tile.

    refs = (w0, b0, w1, b1, ..., wL, bL, out_ref)
    Weights are bf16 (in, out); biases are f32 (1, out). ReLU is applied before
    every linear layer except the first (matches the PyTorch nn.Sequential).
    """
    out_ref = refs[-1]
    param_refs = refs[:-1]
    n_layers = len(param_refs) // 2

    h = x_ref[...]                                   # f32 activations
    for i in range(n_layers):
        w = param_refs[2 * i][...]                   # bf16 (in, out)
        b = param_refs[2 * i + 1][...]               # f32  (1, out)
        if i > 0:
            h = jnp.maximum(h, 0.0)                  # ReLU on VPU in f32
        # Cast to bf16 only at the MXU boundary; accumulate in f32.
        h = jnp.dot(h.astype(jnp.bfloat16), w,
                    preferred_element_type=jnp.float32) + b
    out_ref[...] = h.astype(out_ref.dtype)


def mlp_forward(x, params, *, block_batch=512, interpret=False):
    """x: (batch, input_dim) f32. params: list of (w (in,out) f32, b (1,out) f32)."""
    batch, d_in = x.shape
    n_layers = len(params)

    dims_in = [w.shape[0] for w, _ in params]
    dims_out = [w.shape[1] for w, _ in params]
    pad_in = [_round_up(d, LANE) for d in dims_in]
    pad_out = [_round_up(d, LANE) for d in dims_out]
    assert dims_in[0] == d_in

    # Batch tiling: large tile (>= per-step overhead amortization), multiple of 8.
    tb = min(block_batch, _round_up(batch, SUBLANE))
    batch_p = _round_up(batch, tb)

    # Zero-pad x to (batch_p, pad_in[0]): padded input columns hit zero weight
    # rows, padded batch rows are sliced off at the end.
    x_p = jnp.zeros((batch_p, pad_in[0]), jnp.float32).at[:batch, :d_in].set(x)

    # Zero-pad params to lane-dense shapes; weights to bf16 (halves VMEM/HBM),
    # biases stay f32 (added after f32 accumulation).
    flat = []
    for li, (w, b) in enumerate(params):
        wp = jnp.zeros((pad_in[li], pad_out[li]), jnp.float32)
        wp = wp.at[: w.shape[0], : w.shape[1]].set(w).astype(jnp.bfloat16)
        bp = jnp.zeros((1, pad_out[li]), jnp.float32).at[:, : b.shape[1]].set(b)
        flat.extend([wp, bp])

    out_dim = dims_out[-1]
    out_dim_p = pad_out[-1]
    grid = (batch_p // tb,)

    # x / out are tiled along batch; params are VMEM-resident (constant index_map).
    in_specs = [pl.BlockSpec((tb, pad_in[0]), lambda i: (i, 0))]
    for li in range(n_layers):
        in_specs.append(pl.BlockSpec((pad_in[li], pad_out[li]), lambda i: (0, 0)))
        in_specs.append(pl.BlockSpec((1, pad_out[li]), lambda i: (0, 0)))
    out_spec = pl.BlockSpec((tb, out_dim_p), lambda i: (i, 0))

    flops = 2 * batch_p * sum(pad_in[l] * pad_out[l] for l in range(n_layers))
    bytes_accessed = (
        x_p.size * x_p.dtype.itemsize
        + sum(int(f.size) * f.dtype.itemsize for f in flat)
        + batch_p * out_dim_p * 4
    )
    cost = pl.CostEstimate(flops=flops, transcendentals=0,
                           bytes_accessed=bytes_accessed)

    out_p = pl.pallas_call(
        mlp_kernel,
        out_shape=jax.ShapeDtypeStruct((batch_p, out_dim_p), jnp.float32),
        grid=grid,
        in_specs=in_specs,
        out_specs=out_spec,
        compiler_params=pltpu.CompilerParams(
            dimension_semantics=("parallel",),   # both TCs on v7x; no-op v5e/v6e
        ),
        cost_estimate=cost,
        interpret=interpret,
    )(x_p, *flat)

    # Lane-dense (TB, 128) output block; real output is column 0.
    return out_p[:batch, :out_dim]


def init_params(key, input_dim, width, layers):
    """Deterministic init matching the shapes created in Net.set_parameter.

    PyTorch nn.Linear stores W as (out, in); we build (out, in) then transpose
    to (in, out) for the kernel's h @ W convention.
    """
    dims = [(input_dim, width)]
    for _ in range(layers - 1):
        dims.append((width, width))
    dims.append((width, 1))  # final layer

    params = []
    for (d_in, d_out) in dims:
        key, kw, kb = jax.random.split(key, 3)
        bound = 1.0 / jnp.sqrt(d_in)
        w_oi = jax.random.uniform(kw, (d_out, d_in), jnp.float32, -bound, bound)
        b = jax.random.uniform(kb, (1, d_out), jnp.float32, -bound, bound)
        params.append((w_oi.T, b))  # (in, out), (1, out)
    return params


def reference_forward(x, params):
    """Same math as the kernel (bf16 operands, f32 accumulation) for tight check."""
    h = x
    for i, (w, b) in enumerate(params):
        if i > 0:
            h = jnp.maximum(h, 0.0)
        h = jnp.dot(h.astype(jnp.bfloat16), w.astype(jnp.bfloat16),
                    preferred_element_type=jnp.float32) + b
    return h


def reference_forward_f32(x, params):
    h = x
    for i, (w, b) in enumerate(params):
        if i > 0:
            h = jnp.maximum(h, 0.0)
        h = h @ w + b
    return h


if __name__ == "__main__":
    # parameter = {'input_dim': 16, 'width': 32, 'layers': 3}
    batch, input_dim, width, layers = 8, 16, 32, 3

    key = jax.random.PRNGKey(0)
    key, kx = jax.random.split(key)
    x = jax.random.normal(kx, (batch, input_dim), jnp.float32)

    params = init_params(key, input_dim, width, layers)

    fwd = jax.jit(functools.partial(mlp_forward, block_batch=512))
    out = fwd(x, params)
    jax.block_until_ready(out)

    assert out.shape == (batch, 1), out.shape

    ref_bf16 = reference_forward(x, params)
    assert jnp.allclose(out, ref_bf16, atol=1e-4, rtol=1e-4), "mismatch vs bf16 reference"

    ref_f32 = reference_forward_f32(x, params)
    assert jnp.allclose(out, ref_f32, atol=5e-2, rtol=5e-2), "mismatch vs f32 reference"

    print("KERNEL_OK")
</pallas_src>

<mosaic_0001>
module attributes {stable_mosaic.version = 11 : i64} {
  func.func @mlp_kernel(%arg0: i32, %arg1: memref<8x128xf32, #tpu.memory_space<vmem>>, %arg2: memref<128x128xbf16, #tpu.memory_space<vmem>>, %arg3: memref<1x128xf32, #tpu.memory_space<vmem>>, %arg4: memref<128x128xbf16, #tpu.memory_space<vmem>>, %arg5: memref<1x128xf32, #tpu.memory_space<vmem>>, %arg6: memref<128x128xbf16, #tpu.memory_space<vmem>>, %arg7: memref<1x128xf32, #tpu.memory_space<vmem>>, %arg8: memref<128x128xbf16, #tpu.memory_space<vmem>>, %arg9: memref<1x128xf32, #tpu.memory_space<vmem>>, %arg10: memref<8x128xf32, #tpu.memory_space<vmem>>) attributes {dimension_semantics = [#tpu.dimension_semantics<parallel>], iteration_bounds = array<i64: 1>, scalar_prefetch = 0 : i64, scratch_operands = 0 : i64, tpu.core_type = #tpu.core_type<tc>, window_params = [{transform_indices = @transform_0, window_bounds = array<i64: 8, 128>}, {pipeline_mode = #tpu.pipeline_mode<synchronous>, transform_indices = @transform_1, window_bounds = array<i64: 128, 128>}, {pipeline_mode = #tpu.pipeline_mode<synchronous>, transform_indices = @transform_2, window_bounds = array<i64: 1, 128>}, {pipeline_mode = #tpu.pipeline_mode<synchronous>, transform_indices = @transform_3, window_bounds = array<i64: 128, 128>}, {pipeline_mode = #tpu.pipeline_mode<synchronous>, transform_indices = @transform_4, window_bounds = array<i64: 1, 128>}, {pipeline_mode = #tpu.pipeline_mode<synchronous>, transform_indices = @transform_5, window_bounds = array<i64: 128, 128>}, {pipeline_mode = #tpu.pipeline_mode<synchronous>, transform_indices = @transform_6, window_bounds = array<i64: 1, 128>}, {pipeline_mode = #tpu.pipeline_mode<synchronous>, transform_indices = @transform_7, window_bounds = array<i64: 128, 128>}, {pipeline_mode = #tpu.pipeline_mode<synchronous>, transform_indices = @transform_8, window_bounds = array<i64: 1, 128>}, {transform_indices = @transform_9, window_bounds = array<i64: 8, 128>}]} {
    %c0 = arith.constant 0 : index
    %c0_0 = arith.constant 0 : index
    %0 = vector.load %arg1[%c0, %c0_0] : memref<8x128xf32, #tpu.memory_space<vmem>>, vector<8x128xf32>
    %c0_1 = arith.constant 0 : index
    %c0_2 = arith.constant 0 : index
    %1 = vector.load %arg2[%c0_1, %c0_2] : memref<128x128xbf16, #tpu.memory_space<vmem>>, vector<128x128xbf16>
    %c0_3 = arith.constant 0 : index
    %c0_4 = arith.constant 0 : index
    %2 = vector.load %arg3[%c0_3, %c0_4] : memref<1x128xf32, #tpu.memory_space<vmem>>, vector<1x128xf32>
    %3 = arith.truncf %0 : vector<8x128xf32> to vector<8x128xbf16>
    %cst = arith.constant dense<0.000000e+00> : vector<8x128xf32>
    %4 = tpu.matmul %3, %1, %cst {dimension_numbers = #tpu.dot_dimension_numbers<[1], [0], [0], [1], [0, 0, 1, 1], [], []>} : vector<8x128xbf16>, vector<128x128xbf16>, vector<8x128xf32> -> vector<8x128xf32>
    %5 = vector.broadcast %2 : vector<1x128xf32> to vector<8x128xf32>
    %6 = arith.addf %4, %5 : vector<8x128xf32>
    %c0_5 = arith.constant 0 : index
    %c0_6 = arith.constant 0 : index
    %7 = vector.load %arg4[%c0_5, %c0_6] : memref<128x128xbf16, #tpu.memory_space<vmem>>, vector<128x128xbf16>
    %c0_7 = arith.constant 0 : index
    %c0_8 = arith.constant 0 : index
    %8 = vector.load %arg5[%c0_7, %c0_8] : memref<1x128xf32, #tpu.memory_space<vmem>>, vector<1x128xf32>
    %cst_9 = arith.constant 0.000000e+00 : f32
    %9 = vector.broadcast %cst_9 : f32 to vector<8x128xf32>
    %10 = arith.maximumf %6, %9 : vector<8x128xf32>
    %11 = arith.truncf %10 : vector<8x128xf32> to vector<8x128xbf16>
    %cst_10 = arith.constant dense<0.000000e+00> : vector<8x128xf32>
    %12 = tpu.matmul %11, %7, %cst_10 {dimension_numbers = #tpu.dot_dimension_numbers<[1], [0], [0], [1], [0, 0, 1, 1], [], []>} : vector<8x128xbf16>, vector<128x128xbf16>, vector<8x128xf32> -> vector<8x128xf32>
    %13 = vector.broadcast %8 : vector<1x128xf32> to vector<8x128xf32>
    %14 = arith.addf %12, %13 : vector<8x128xf32>
    %c0_11 = arith.constant 0 : index
    %c0_12 = arith.constant 0 : index
    %15 = vector.load %arg6[%c0_11, %c0_12] : memref<128x128xbf16, #tpu.memory_space<vmem>>, vector<128x128xbf16>
    %c0_13 = arith.constant 0 : index
    %c0_14 = arith.constant 0 : index
    %16 = vector.load %arg7[%c0_13, %c0_14] : memref<1x128xf32, #tpu.memory_space<vmem>>, vector<1x128xf32>
    %cst_15 = arith.constant 0.000000e+00 : f32
    %17 = vector.broadcast %cst_15 : f32 to vector<8x128xf32>
    %18 = arith.maximumf %14, %17 : vector<8x128xf32>
    %19 = arith.truncf %18 : vector<8x128xf32> to vector<8x128xbf16>
    %cst_16 = arith.constant dense<0.000000e+00> : vector<8x128xf32>
    %20 = tpu.matmul %19, %15, %cst_16 {dimension_numbers = #tpu.dot_dimension_numbers<[1], [0], [0], [1], [0, 0, 1, 1], [], []>} : vector<8x128xbf16>, vector<128x128xbf16>, vector<8x128xf32> -> vector<8x128xf32>
    %21 = vector.broadcast %16 : vector<1x128xf32> to vector<8x128xf32>
    %22 = arith.addf %20, %21 : vector<8x128xf32>
    %c0_17 = arith.constant 0 : index
    %c0_18 = arith.constant 0 : index
    %23 = vector.load %arg8[%c0_17, %c0_18] : memref<128x128xbf16, #tpu.memory_space<vmem>>, vector<128x128xbf16>
    %c0_19 = arith.constant 0 : index
    %c0_20 = arith.constant 0 : index
    %24 = vector.load %arg9[%c0_19, %c0_20] : memref<1x128xf32, #tpu.memory_space<vmem>>, vector<1x128xf32>
    %cst_21 = arith.constant 0.000000e+00 : f32
    %25 = vector.broadcast %cst_21 : f32 to vector<8x128xf32>
    %26 = arith.maximumf %22, %25 : vector<8x128xf32>
    %27 = arith.truncf %26 : vector<8x128xf32> to vector<8x128xbf16>
    %cst_22 = arith.constant dense<0.000000e+00> : vector<8x128xf32>
    %28 = tpu.matmul %27, %23, %cst_22 {dimension_numbers = #tpu.dot_dimension_numbers<[1], [0], [0], [1], [0, 0, 1, 1], [], []>} : vector<8x128xbf16>, vector<128x128xbf16>, vector<8x128xf32> -> vector<8x128xf32>
    %29 = vector.broadcast %24 : vector<1x128xf32> to vector<8x128xf32>
    %30 = arith.addf %28, %29 : vector<8x128xf32>
    %c0_23 = arith.constant 0 : index
    %c0_24 = arith.constant 0 : index
    %31 = vector.load %arg10[%c0_23, %c0_24] : memref<8x128xf32, #tpu.memory_space<vmem>>, vector<8x128xf32>
    tpu.vector_store %arg10[%c0_23, %c0_24], %30 {strides = array<i32>} : memref<8x128xf32, #tpu.memory_space<vmem>>, vector<8x128xf32>,
    return
  }
  func.func @transform_0(%arg0: i32) -> (i32, i32) {
    %c0_i32 = arith.constant 0 : i32
    %c0_i32_0 = arith.constant 0 : i32
    return %arg0, %c0_i32 : i32, i32
  }
  func.func @transform_1(%arg0: i32) -> (i32, i32) {
    %c0_i32 = arith.constant 0 : i32
    %c0_i32_0 = arith.constant 0 : i32
    %c0_i32_1 = arith.constant 0 : i32
    return %c0_i32, %c0_i32_0 : i32, i32
  }
  func.func @transform_2(%arg0: i32) -> (i32, i32) {
    %c0_i32 = arith.constant 0 : i32
    %c0_i32_0 = arith.constant 0 : i32
    %c0_i32_1 = arith.constant 0 : i32
    return %c0_i32, %c0_i32_0 : i32, i32
  }
  func.func @transform_3(%arg0: i32) -> (i32, i32) {
    %c0_i32 = arith.constant 0 : i32
    %c0_i32_0 = arith.constant 0 : i32
    %c0_i32_1 = arith.constant 0 : i32
    return %c0_i32, %c0_i32_0 : i32, i32
  }
  func.func @transform_4(%arg0: i32) -> (i32, i32) {
    %c0_i32 = arith.constant 0 : i32
    %c0_i32_0 = arith.constant 0 : i32
    %c0_i32_1 = arith.constant 0 : i32
    return %c0_i32, %c0_i32_0 : i32, i32
  }
  func.func @transform_5(%arg0: i32) -> (i32, i32) {
    %c0_i32 = arith.constant 0 : i32
    %c0_i32_0 = arith.constant 0 : i32
    %c0_i32_1 = arith.constant 0 : i32
    return %c0_i32, %c0_i32_0 : i32, i32
  }
  func.func @transform_6(%arg0: i32) -> (i32, i32) {
    %c0_i32 = arith.constant 0 : i32
    %c0_i32_0 = arith.constant 0 : i32
    %c0_i32_1 = arith.constant 0 : i32
    return %c0_i32, %c0_i32_0 : i32, i32
  }
  func.func @transform_7(%arg0: i32) -> (i32, i32) {
    %c0_i32 = arith.constant 0 : i32
    %c0_i32_0 = arith.constant 0 : i32
    %c0_i32_1 = arith.constant 0 : i32
    return %c0_i32, %c0_i32_0 : i32, i32
  }
  func.func @transform_8(%arg0: i32) -> (i32, i32) {
    %c0_i32 = arith.constant 0 : i32
    %c0_i32_0 = arith.constant 0 : i32
    %c0_i32_1 = arith.constant 0 : i32
    return %c0_i32, %c0_i32_0 : i32, i32
  }
  func.func @transform_9(%arg0: i32) -> (i32, i32) {
    %c0_i32 = arith.constant 0 : i32
    %c0_i32_0 = arith.constant 0 : i32
    return %arg0, %c0_i32 : i32, i32
  }
}

</mosaic_0001>

<bundles_post_ra>
// kernel: mlp_forward.1
= control target key start
LH: loop header
LB: loop body
LE: loop exit
PB: predicated region body
PF: predicated region fallthrough
CT: control target
= control target key end

     0   :  { %s697_s1 = inlined_call_operand.vmem [shape: bf16[128,128], index: 1, kind: input, shape index: {}]   ;;  %s698_s3 = inlined_call_operand.vmem [shape: bf16[128,128], index: 3, kind: input, shape index: {}]   ;;  %s699_s2 = inlined_call_operand.vmem [shape: f32[1,128], index: 2, kind: input, shape index: {}]   ;;  %s700_s0 = inlined_call_operand.vmem [shape: f32[8,128], index: 0, kind: input, shape index: {}]   ;;  %s701_s4 = inlined_call_operand.vmem [shape: f32[1,128], index: 4, kind: input, shape index: {}]   ;;  %s702_s5 = inlined_call_operand.vmem [shape: bf16[128,128], index: 5, kind: input, shape index: {}]   ;;  %s703_s6 = inlined_call_operand.vmem [shape: f32[1,128], index: 6, kind: input, shape index: {}]   ;;  %s704_s7 = inlined_call_operand.vmem [shape: bf16[128,128], index: 7, kind: input, shape index: {}]   ;;  %s705_s8 = inlined_call_operand.vmem [shape: f32[1,128], index: 8, kind: input, shape index: {}]   ;;  %s706_s9 = inlined_call_operand.vmem [shape: f32[8,128], index: 9, kind: output, shape index: {}]  }
   0x1   :  { %v504_v0 = vld [vmem:[%s697_s1 + $0x38] sm:$0xff]  ;;  %v503_v1 = vld [vmem:[%s697_s1 + $0x30] sm:$0xff]  ;;  %v502_v4 = vld [vmem:[%s697_s1 + $0x28] sm:$0xff] }
   0x2   :  { %102 = vmatpush.bf16.msra.mxu0 %v504_v0  ;;  %v512_v2 = vld [vmem:[%s698_s3 + $0x38] sm:$0xff]  ;;  %v511_v3 = vld [vmem:[%s698_s3 + $0x30] sm:$0xff]  ;;  %v510_v5 = vld [vmem:[%s698_s3 + $0x28] sm:$0xff] }
   0x3   :  { %185 = vmatpush.bf16.msra.mxu1 %v512_v2  ;;  %v501_v6 = vld [vmem:[%s697_s1 + $0x20] sm:$0xff]  ;;  %v500_v8 = vld [vmem:[%s697_s1 + $0x18] sm:$0xff]  ;;  %v499_v10 = vld [vmem:[%s697_s1 + $0x10] sm:$0xff] }
   0x4   :  { %v509_v7 = vld [vmem:[%s698_s3 + $0x20] sm:$0xff]  ;;  %v508_v9 = vld [vmem:[%s698_s3 + $0x18] sm:$0xff]  ;;  %v507_v11 = vld [vmem:[%s698_s3 + $0x10] sm:$0xff] }
   0x5   :  { %v498_v12 = vld [vmem:[%s697_s1 + $0x8] sm:$0xff]  ;;  %v497_v13 = vld [vmem:[%s697_s1] sm:$0xff]  ;;  %v520_v18 = vld [vmem:[%s702_s5 + $0x38] sm:$0xff] }
   0x6   :  { %103 = vmatpush.bf16.msra.mxu0 %v503_v1  ;;  %v32_v14 = vld [vmem:[%s700_s0] sm:$0xff]  ;;  %v506_v16 = vld [vmem:[%s698_s3 + $0x8] sm:$0xff]  ;;  %268 = vmatpush.bf16.msra.mxu2 %v520_v18  ;;  %v519_v19 = vld [vmem:[%s702_s5 + $0x30] sm:$0xff] }
   0x7   :  { %186 = vmatpush.bf16.msra.mxu1 %v511_v3  ;;  %v50_v15 = vpack.c.bf16 %v32_v14, %v32_v14  ;;  %v505_v17 = vld [vmem:[%s698_s3] sm:$0xff]  ;;  %v518_v20 = vld [vmem:[%s702_s5 + $0x28] sm:$0xff]  ;;  %v516_v22 = vld [vmem:[%s702_s5 + $0x18] sm:$0xff] }
   0x8   :  { %v517_v21 = vld [vmem:[%s702_s5 + $0x20] sm:$0xff]  ;;  %v515_v23 = vld [vmem:[%s702_s5 + $0x10] sm:$0xff]  ;;  %v514_v30 = vld [vmem:[%s702_s5 + $0x8] sm:$0xff] }
   0x9   :  { %v529_v24 = vld [vmem:[%s699_s2] ss:$0 sm:$0xff]  ;;  %v528_v32 = vld [vmem:[%s704_s7 + $0x38] sm:$0xff]  ;;  %v527_v33 = vld [vmem:[%s704_s7 + $0x30] sm:$0xff] }
   0xa   :  { %104 = vmatpush.bf16.msra.mxu0 %v502_v4  ;;  %269 = vmatpush.bf16.msra.mxu2 %v519_v19  ;;  %v513_v31 = vld [vmem:[%s702_s5] sm:$0xff]  ;;  %v526_v34 = vld [vmem:[%s704_s7 + $0x28] sm:$0xff]  ;;  %v524_v36 = vld [vmem:[%s704_s7 + $0x18] sm:$0xff] }
   0xb   :  { %187 = vmatpush.bf16.msra.mxu1 %v510_v5  ;;  %351 = vmatpush.bf16.msra.mxu3 %v528_v32  ;;  %v525_v35 = vld [vmem:[%s704_s7 + $0x20] sm:$0xff]  ;;  %v523_v37 = vld [vmem:[%s704_s7 + $0x10] sm:$0xff]  ;;  %v522_v44 = vld [vmem:[%s704_s7 + $0x8] sm:$0xff] }
   0xc   :  { %v530_v38 = vld [vmem:[%s701_s4] ss:$0 sm:$0xff] }
   0xd   :  { %v521_v45 = vld [vmem:[%s704_s7] sm:$0xff] }
   0xe   :  { %105 = vmatpush.bf16.msra.mxu0 %v501_v6  ;;  %270 = vmatpush.bf16.msra.mxu2 %v518_v20  ;;  %v531_v46 = vld [vmem:[%s703_s6] ss:$0 sm:$0xff] }
   0xf   :  { %188 = vmatpush.bf16.msra.mxu1 %v509_v7  ;;  %352 = vmatpush.bf16.msra.mxu3 %v527_v33  ;;  %v532_v52 = vld [vmem:[%s705_s8] ss:$0 sm:$0xff] }
  0x12   :  { %106 = vmatpush.bf16.msra.mxu0 %v500_v8  ;;  %271 = vmatpush.bf16.msra.mxu2 %v517_v21 }
  0x13   :  { %189 = vmatpush.bf16.msra.mxu1 %v508_v9  ;;  %353 = vmatpush.bf16.msra.mxu3 %v526_v34 }
  0x16   :  { %107 = vmatpush.bf16.msra.mxu0 %v499_v10  ;;  %272 = vmatpush.bf16.msra.mxu2 %v516_v22 }
  0x17   :  { %190 = vmatpush.bf16.msra.mxu1 %v507_v11  ;;  %354 = vmatpush.bf16.msra.mxu3 %v525_v35 }
  0x1a   :  { %108 = vmatpush.bf16.msra.mxu0 %v498_v12  ;;  %273 = vmatpush.bf16.msra.mxu2 %v515_v23 }
  0x1b   :  { %191 = vmatpush.bf16.msra.mxu1 %v506_v16  ;;  %355 = vmatpush.bf16.msra.mxu3 %v524_v36 }
  0x1e   :  { %109 = vmatpush.bf16.msra.mxu0 %v497_v13  ;;  %274 = vmatpush.bf16.msra.mxu2 %v514_v30 }
  0x1f   :  { %192 = vmatpush.bf16.msra.mxu1 %v505_v17  ;;  %356 = vmatpush.bf16.msra.mxu3 %v523_v37 }
  0x21   :  { %110 = vmatmul.bf16.vlgmr.msra.gmra.mxu0 %v50_v15 }
  0x22   :  { %275 = vmatpush.bf16.msra.mxu2 %v513_v31 }
  0x23   :  { %357 = vmatpush.bf16.msra.mxu3 %v522_v44 }
  0x27   :  { %358 = vmatpush.bf16.msra.mxu3 %v521_v45 }
  0x9e   :  { %v111_v25 = vpop.f32.mrf.mxu0 }
  0x9f   :  { %v112_v26 = vadd.f32 %v529_v24, %v111_v25 }
  0xa1   :  { %v132_v27 = vmax.f32 %v112_v26, 0.0 }
  0xa3   :  { %v133_v28 = vpack.c.bf16 %v132_v27, %v132_v27 }
  0xa5   :  { %193 = vmatmul.bf16.vlgmr.msra.gmra.mxu1 %v133_v28 }
  0xa6   :  { %v113_v29 = vpop.f32.mrf.mxu0 }
 0x122   :  { %v194_v39 = vpop.f32.mrf.mxu1 }
 0x123   :  { %v195_v40 = vadd.f32 %v530_v38, %v194_v39 }
 0x125   :  { %v215_v41 = vmax.f32 %v195_v40, 0.0 }
 0x127   :  { %v216_v42 = vpack.c.bf16 %v215_v41, %v215_v41 }
 0x129   :  { %276 = vmatmul.bf16.vlgmr.msra.gmra.mxu2 %v216_v42 }
 0x12a   :  { %v196_v43 = vpop.f32.mrf.mxu1 }
 0x1ac   :  { %v277_v47 = vpop.f32.mrf.mxu2 }
 0x1ad   :  { %v278_v48 = vadd.f32 %v531_v46, %v277_v47 }
 0x1af   :  { %v298_v49 = vmax.f32 %v278_v48, 0.0 }
 0x1b1   :  { %v299_v50 = vpack.c.bf16 %v298_v49, %v298_v49 }
 0x1b3   :  { %359 = vmatmul.bf16.vlgmr.msra.gmra.mxu3 %v299_v50 }
 0x1b4   :  { %v279_v51 = vpop.f32.mrf.mxu2 }
 0x236   :  { %v360_v53 = vpop.f32.mrf.mxu3 }
 0x237   :  { %v361_v54 = vadd.f32 %v532_v52, %v360_v53 }
 0x239   :  { %364 = vst [vmem:[%s706_s9] sm:$0xff] %v361_v54 }
 0x23e   :  { %v362_v55 = vpop.f32.mrf.mxu3 }

</bundles_post_ra>
